<compile_context>
chip_gen: v5e
topology: v5e:2x2
jax: 0.10.0
libtpu: 0.0.40
codegen_flags: <defaults>
</compile_context>

<pallas_src>
import math
import functools

import jax
import jax.numpy as jnp
from jax import lax
from jax.experimental import pallas as pl
from jax.experimental.pallas import tpu as pltpu


def _round_up(x, m):
    return (x + m - 1) // m * m


def _embed_gather_kernel(ids_ref, emb_hbm, out_ref, slab, sems, *,
                         scale, tile_t, n_flight):
    """Gather `tile_t` embedding rows HBM -> VMEM slab with a rolling window of
    `n_flight` in-flight row DMAs, then scale + store the dense output block.

    ids_ref : SMEM (1, tile_t) int32   — token ids for this tile
    emb_hbm : ANY/HBM (V, D)           — full embedding table (no auto-DMA)
    out_ref : VMEM (tile_t, D)         — output block
    slab    : VMEM (tile_t, D) scratch — gather destination
    sems    : DMA semaphores (n_flight,)
    """

    def row_copy(dst_row, src_row):
        return pltpu.make_async_copy(
            emb_hbm.at[pl.ds(src_row, 1), :],
            slab.at[pl.ds(dst_row, 1), :],
            sems.at[dst_row % n_flight],
        )

    def start_row(i):
        # NOTE: ids >= vocab_size are undefined behaviour (as in nn.Embedding);
        # the DMA bounds check will fault on them rather than clamp.
        row_copy(i, ids_ref[0, i]).start()

    def wait_row(i):
        # Only destination size + semaphore matter for the wait.
        row_copy(i, 0).wait()

    # Prime the pipeline (n_flight is small -> static unrolled python loop).
    for i in range(min(n_flight, tile_t)):
        start_row(i)

    # Rolling window: wait on row i, immediately refill with row i + n_flight.
    def body(i, carry):
        wait_row(i)

        @pl.when(i + n_flight < tile_t)
        def _():
            start_row(i + n_flight)

        return carry

    lax.fori_loop(0, tile_t, body, 0)

    # All rows have landed: one dense, unmasked (tile_t, D) store; the VPU
    # multiply is hidden under the neighbouring grid steps' DMAs.
    out_ref[...] = slab[...] * scale


def input_embeddings(token_ids, emb_table, *, tile_t=256, n_flight=8):
    """token_ids: (B, S) int; emb_table: (V, D) -> (B, S, D) = table[ids]*sqrt(D)."""
    B, S = token_ids.shape
    V, D = emb_table.shape
    scale = math.sqrt(D)

    N = B * S
    # Tokens per grid step: multiple of 8 (sublane) so the (tile_t, D) output
    # block is a dense vreg store; cap at the (padded) token count.
    tile_t = min(tile_t, _round_up(N, 8))
    n_pad = _round_up(N, tile_t)
    num_tiles = n_pad // tile_t

    flat_ids = token_ids.reshape(-1).astype(jnp.int32)
    if n_pad != N:
        flat_ids = jnp.pad(flat_ids, (0, n_pad - N))      # pad with row 0 (valid)
    ids_2d = flat_ids.reshape(num_tiles, tile_t)          # long axis last (SMEM)

    kernel = functools.partial(
        _embed_gather_kernel, scale=scale, tile_t=tile_t, n_flight=n_flight)

    out_flat = pl.pallas_call(
        kernel,
        out_shape=jax.ShapeDtypeStruct((n_pad, D), emb_table.dtype),
        grid_spec=pltpu.PrefetchScalarGridSpec(
            num_scalar_prefetch=0,
            grid=(num_tiles,),
            in_specs=[
                # Per-step (1, tile_t) slice of token ids, landed in SMEM.
                pl.BlockSpec((1, tile_t), lambda i: (i, 0),
                             memory_space=pltpu.MemorySpace.SMEM),
                # Embedding table stays in HBM; rows gathered manually via DMA.
                pl.BlockSpec(memory_space=pl.ANY),
            ],
            out_specs=pl.BlockSpec((tile_t, D), lambda i: (i, 0)),
            scratch_shapes=[
                pltpu.VMEM((tile_t, D), emb_table.dtype),   # gather slab
                pltpu.SemaphoreType.DMA((n_flight,)),       # rolling DMA window
            ],
        ),
        compiler_params=pltpu.CompilerParams(
            # Distinct output block per step, no accumulator -> fully parallel;
            # uses both TensorCores on v7x, harmless on v5e/v6e.
            dimension_semantics=("parallel",),
        ),
    )(ids_2d, emb_table)

    return out_flat[:N].reshape(B, S, D)


if __name__ == "__main__":
    d_model = 128
    vocab_size = 256
    batch, seq = 2, 8

    key = jax.random.PRNGKey(0)
    k_emb, k_ids = jax.random.split(key)

    # Deterministic synthetic parameters (nn.Embedding(vocab_size, d_model).weight)
    emb_table = jax.random.normal(k_emb, (vocab_size, d_model), dtype=jnp.float32)
    token_ids = jax.random.randint(k_ids, (batch, seq), 0, vocab_size, dtype=jnp.int32)

    out = input_embeddings(token_ids, emb_table)
    out = jax.block_until_ready(out)

    # Reference check (plain JAX gather).
    ref = jnp.take(emb_table, token_ids, axis=0) * math.sqrt(d_model)
    assert out.shape == (batch, seq, d_model)
    assert jnp.allclose(out, ref, atol=1e-6, rtol=1e-6)

    print("KERNEL_OK")
</pallas_src>

<mosaic_0001>
module attributes {stable_mosaic.version = 11 : i64} {
  func.func @_embed_gather_kernel(%arg0: i32, %arg1: memref<1x16xi32, #tpu.memory_space<smem>>, %arg2: memref<256x128xf32, #tpu.memory_space<any>>, %arg3: memref<16x128xf32, #tpu.memory_space<vmem>>, %arg4: memref<16x128xf32, #tpu.memory_space<vmem>>, %arg5: memref<8x!tpu.dma_semaphore, #tpu.memory_space<semaphore_mem>>) attributes {dimension_semantics = [#tpu.dimension_semantics<parallel>], iteration_bounds = array<i64: 1>, scalar_prefetch = 0 : i64, scratch_operands = 2 : i64, tpu.core_type = #tpu.core_type<tc>, window_params = [{transform_indices = @transform_0, window_bounds = array<i64: 1, 16>}, {}, {transform_indices = @transform_2, window_bounds = array<i64: 16, 128>}]} {
    %c0 = arith.constant 0 : index
    %c0_0 = arith.constant 0 : index
    %0 = memref.load %arg1[%c0, %c0_0] : memref<1x16xi32, #tpu.memory_space<smem>>
    %c0_i32 = arith.constant 0 : i32
    %c0_i32_1 = arith.constant 0 : i32
    %1 = tpu.memref_slice %arg2[%0, %c0_i32_1] : memref<256x128xf32, #tpu.memory_space<any>> -> memref<1x128xf32, #tpu.memory_space<any>>
    %c0_i32_2 = arith.constant 0 : i32
    %c0_i32_3 = arith.constant 0 : i32
    %2 = tpu.memref_slice %arg4[%c0_i32_2, %c0_i32_3] : memref<16x128xf32, #tpu.memory_space<vmem>> -> memref<1x128xf32, #tpu.memory_space<vmem>>
    %3 = tpu.memref_slice %arg5[%c0_i32] : memref<8x!tpu.dma_semaphore, #tpu.memory_space<semaphore_mem>> -> memref<1x!tpu.dma_semaphore, #tpu.memory_space<semaphore_mem>>
    %4 = tpu.memref_squeeze %3 : memref<1x!tpu.dma_semaphore, #tpu.memory_space<semaphore_mem>> -> memref<!tpu.dma_semaphore, #tpu.memory_space<semaphore_mem>>
    tpu.enqueue_dma source(%1 : memref<1x128xf32, #tpu.memory_space<any>>) target(%2 : memref<1x128xf32, #tpu.memory_space<vmem>>) target_semaphore(%4 : memref<!tpu.dma_semaphore, #tpu.memory_space<semaphore_mem>>)
    %c0_4 = arith.constant 0 : index
    %c1 = arith.constant 1 : index
    %5 = memref.load %arg1[%c0_4, %c1] : memref<1x16xi32, #tpu.memory_space<smem>>
    %c1_i32 = arith.constant 1 : i32
    %c0_i32_5 = arith.constant 0 : i32
    %6 = tpu.memref_slice %arg2[%5, %c0_i32_5] : memref<256x128xf32, #tpu.memory_space<any>> -> memref<1x128xf32, #tpu.memory_space<any>>
    %c1_i32_6 = arith.constant 1 : i32
    %c0_i32_7 = arith.constant 0 : i32
    %7 = tpu.memref_slice %arg4[%c1_i32_6, %c0_i32_7] : memref<16x128xf32, #tpu.memory_space<vmem>> -> memref<1x128xf32, #tpu.memory_space<vmem>>
    %8 = tpu.memref_slice %arg5[%c1_i32] : memref<8x!tpu.dma_semaphore, #tpu.memory_space<semaphore_mem>> -> memref<1x!tpu.dma_semaphore, #tpu.memory_space<semaphore_mem>>
    %9 = tpu.memref_squeeze %8 : memref<1x!tpu.dma_semaphore, #tpu.memory_space<semaphore_mem>> -> memref<!tpu.dma_semaphore, #tpu.memory_space<semaphore_mem>>
    tpu.enqueue_dma source(%6 : memref<1x128xf32, #tpu.memory_space<any>>) target(%7 : memref<1x128xf32, #tpu.memory_space<vmem>>) target_semaphore(%9 : memref<!tpu.dma_semaphore, #tpu.memory_space<semaphore_mem>>)
    %c0_8 = arith.constant 0 : index
    %c2 = arith.constant 2 : index
    %10 = memref.load %arg1[%c0_8, %c2] : memref<1x16xi32, #tpu.memory_space<smem>>
    %c2_i32 = arith.constant 2 : i32
    %c0_i32_9 = arith.constant 0 : i32
    %11 = tpu.memref_slice %arg2[%10, %c0_i32_9] : memref<256x128xf32, #tpu.memory_space<any>> -> memref<1x128xf32, #tpu.memory_space<any>>
    %c2_i32_10 = arith.constant 2 : i32
    %c0_i32_11 = arith.constant 0 : i32
    %12 = tpu.memref_slice %arg4[%c2_i32_10, %c0_i32_11] : memref<16x128xf32, #tpu.memory_space<vmem>> -> memref<1x128xf32, #tpu.memory_space<vmem>>
    %13 = tpu.memref_slice %arg5[%c2_i32] : memref<8x!tpu.dma_semaphore, #tpu.memory_space<semaphore_mem>> -> memref<1x!tpu.dma_semaphore, #tpu.memory_space<semaphore_mem>>
    %14 = tpu.memref_squeeze %13 : memref<1x!tpu.dma_semaphore, #tpu.memory_space<semaphore_mem>> -> memref<!tpu.dma_semaphore, #tpu.memory_space<semaphore_mem>>
    tpu.enqueue_dma source(%11 : memref<1x128xf32, #tpu.memory_space<any>>) target(%12 : memref<1x128xf32, #tpu.memory_space<vmem>>) target_semaphore(%14 : memref<!tpu.dma_semaphore, #tpu.memory_space<semaphore_mem>>)
    %c0_12 = arith.constant 0 : index
    %c3 = arith.constant 3 : index
    %15 = memref.load %arg1[%c0_12, %c3] : memref<1x16xi32, #tpu.memory_space<smem>>
    %c3_i32 = arith.constant 3 : i32
    %c0_i32_13 = arith.constant 0 : i32
    %16 = tpu.memref_slice %arg2[%15, %c0_i32_13] : memref<256x128xf32, #tpu.memory_space<any>> -> memref<1x128xf32, #tpu.memory_space<any>>
    %c3_i32_14 = arith.constant 3 : i32
    %c0_i32_15 = arith.constant 0 : i32
    %17 = tpu.memref_slice %arg4[%c3_i32_14, %c0_i32_15] : memref<16x128xf32, #tpu.memory_space<vmem>> -> memref<1x128xf32, #tpu.memory_space<vmem>>
    %18 = tpu.memref_slice %arg5[%c3_i32] : memref<8x!tpu.dma_semaphore, #tpu.memory_space<semaphore_mem>> -> memref<1x!tpu.dma_semaphore, #tpu.memory_space<semaphore_mem>>
    %19 = tpu.memref_squeeze %18 : memref<1x!tpu.dma_semaphore, #tpu.memory_space<semaphore_mem>> -> memref<!tpu.dma_semaphore, #tpu.memory_space<semaphore_mem>>
    tpu.enqueue_dma source(%16 : memref<1x128xf32, #tpu.memory_space<any>>) target(%17 : memref<1x128xf32, #tpu.memory_space<vmem>>) target_semaphore(%19 : memref<!tpu.dma_semaphore, #tpu.memory_space<semaphore_mem>>)
    %c0_16 = arith.constant 0 : index
    %c4 = arith.constant 4 : index
    %20 = memref.load %arg1[%c0_16, %c4] : memref<1x16xi32, #tpu.memory_space<smem>>
    %c4_i32 = arith.constant 4 : i32
    %c0_i32_17 = arith.constant 0 : i32
    %21 = tpu.memref_slice %arg2[%20, %c0_i32_17] : memref<256x128xf32, #tpu.memory_space<any>> -> memref<1x128xf32, #tpu.memory_space<any>>
    %c4_i32_18 = arith.constant 4 : i32
    %c0_i32_19 = arith.constant 0 : i32
    %22 = tpu.memref_slice %arg4[%c4_i32_18, %c0_i32_19] : memref<16x128xf32, #tpu.memory_space<vmem>> -> memref<1x128xf32, #tpu.memory_space<vmem>>
    %23 = tpu.memref_slice %arg5[%c4_i32] : memref<8x!tpu.dma_semaphore, #tpu.memory_space<semaphore_mem>> -> memref<1x!tpu.dma_semaphore, #tpu.memory_space<semaphore_mem>>
    %24 = tpu.memref_squeeze %23 : memref<1x!tpu.dma_semaphore, #tpu.memory_space<semaphore_mem>> -> memref<!tpu.dma_semaphore, #tpu.memory_space<semaphore_mem>>
    tpu.enqueue_dma source(%21 : memref<1x128xf32, #tpu.memory_space<any>>) target(%22 : memref<1x128xf32, #tpu.memory_space<vmem>>) target_semaphore(%24 : memref<!tpu.dma_semaphore, #tpu.memory_space<semaphore_mem>>)
    %c0_20 = arith.constant 0 : index
    %c5 = arith.constant 5 : index
    %25 = memref.load %arg1[%c0_20, %c5] : memref<1x16xi32, #tpu.memory_space<smem>>
    %c5_i32 = arith.constant 5 : i32
    %c0_i32_21 = arith.constant 0 : i32
    %26 = tpu.memref_slice %arg2[%25, %c0_i32_21] : memref<256x128xf32, #tpu.memory_space<any>> -> memref<1x128xf32, #tpu.memory_space<any>>
    %c5_i32_22 = arith.constant 5 : i32
    %c0_i32_23 = arith.constant 0 : i32
    %27 = tpu.memref_slice %arg4[%c5_i32_22, %c0_i32_23] : memref<16x128xf32, #tpu.memory_space<vmem>> -> memref<1x128xf32, #tpu.memory_space<vmem>>
    %28 = tpu.memref_slice %arg5[%c5_i32] : memref<8x!tpu.dma_semaphore, #tpu.memory_space<semaphore_mem>> -> memref<1x!tpu.dma_semaphore, #tpu.memory_space<semaphore_mem>>
    %29 = tpu.memref_squeeze %28 : memref<1x!tpu.dma_semaphore, #tpu.memory_space<semaphore_mem>> -> memref<!tpu.dma_semaphore, #tpu.memory_space<semaphore_mem>>
    tpu.enqueue_dma source(%26 : memref<1x128xf32, #tpu.memory_space<any>>) target(%27 : memref<1x128xf32, #tpu.memory_space<vmem>>) target_semaphore(%29 : memref<!tpu.dma_semaphore, #tpu.memory_space<semaphore_mem>>)
    %c0_24 = arith.constant 0 : index
    %c6 = arith.constant 6 : index
    %30 = memref.load %arg1[%c0_24, %c6] : memref<1x16xi32, #tpu.memory_space<smem>>
    %c6_i32 = arith.constant 6 : i32
    %c0_i32_25 = arith.constant 0 : i32
    %31 = tpu.memref_slice %arg2[%30, %c0_i32_25] : memref<256x128xf32, #tpu.memory_space<any>> -> memref<1x128xf32, #tpu.memory_space<any>>
    %c6_i32_26 = arith.constant 6 : i32
    %c0_i32_27 = arith.constant 0 : i32
    %32 = tpu.memref_slice %arg4[%c6_i32_26, %c0_i32_27] : memref<16x128xf32, #tpu.memory_space<vmem>> -> memref<1x128xf32, #tpu.memory_space<vmem>>
    %33 = tpu.memref_slice %arg5[%c6_i32] : memref<8x!tpu.dma_semaphore, #tpu.memory_space<semaphore_mem>> -> memref<1x!tpu.dma_semaphore, #tpu.memory_space<semaphore_mem>>
    %34 = tpu.memref_squeeze %33 : memref<1x!tpu.dma_semaphore, #tpu.memory_space<semaphore_mem>> -> memref<!tpu.dma_semaphore, #tpu.memory_space<semaphore_mem>>
    tpu.enqueue_dma source(%31 : memref<1x128xf32, #tpu.memory_space<any>>) target(%32 : memref<1x128xf32, #tpu.memory_space<vmem>>) target_semaphore(%34 : memref<!tpu.dma_semaphore, #tpu.memory_space<semaphore_mem>>)
    %c0_28 = arith.constant 0 : index
    %c7 = arith.constant 7 : index
    %35 = memref.load %arg1[%c0_28, %c7] : memref<1x16xi32, #tpu.memory_space<smem>>
    %c7_i32 = arith.constant 7 : i32
    %c0_i32_29 = arith.constant 0 : i32
    %36 = tpu.memref_slice %arg2[%35, %c0_i32_29] : memref<256x128xf32, #tpu.memory_space<any>> -> memref<1x128xf32, #tpu.memory_space<any>>
    %c7_i32_30 = arith.constant 7 : i32
    %c0_i32_31 = arith.constant 0 : i32
    %37 = tpu.memref_slice %arg4[%c7_i32_30, %c0_i32_31] : memref<16x128xf32, #tpu.memory_space<vmem>> -> memref<1x128xf32, #tpu.memory_space<vmem>>
    %38 = tpu.memref_slice %arg5[%c7_i32] : memref<8x!tpu.dma_semaphore, #tpu.memory_space<semaphore_mem>> -> memref<1x!tpu.dma_semaphore, #tpu.memory_space<semaphore_mem>>
    %39 = tpu.memref_squeeze %38 : memref<1x!tpu.dma_semaphore, #tpu.memory_space<semaphore_mem>> -> memref<!tpu.dma_semaphore, #tpu.memory_space<semaphore_mem>>
    tpu.enqueue_dma source(%36 : memref<1x128xf32, #tpu.memory_space<any>>) target(%37 : memref<1x128xf32, #tpu.memory_space<vmem>>) target_semaphore(%39 : memref<!tpu.dma_semaphore, #tpu.memory_space<semaphore_mem>>)
    %c0_i32_32 = arith.constant 0 : i32
    %c16_i32 = arith.constant 16 : i32
    %40 = arith.addi %c0_i32_32, %c16_i32 : i32
    %c1_i32_33 = arith.constant 1 : i32
    scf.for %arg6 = %c0_i32_32 to %40 step %c1_i32_33  : i32 {
      %c8_i32 = arith.constant 8 : i32
      %c0_i32_39 = arith.constant 0 : i32
      %45 = arith.cmpi eq, %c8_i32, %c0_i32_39 : i32
      %c1_i32_40 = arith.constant 1 : i32
      %46 = arith.select %45, %c1_i32_40, %c8_i32 : i32
      %47 = arith.remsi %arg6, %46 : i32
      %c0_i32_41 = arith.constant 0 : i32
      %48 = arith.cmpi ne, %47, %c0_i32_41 : i32
      %c0_i32_42 = arith.constant 0 : i32
      %49 = arith.cmpi slt, %47, %c0_i32_42 : i32
      %c0_i32_43 = arith.constant 0 : i32
      %50 = arith.cmpi slt, %46, %c0_i32_43 : i32
      %51 = arith.xori %49, %50 : i1
      %52 = arith.andi %51, %48 : i1
      %53 = arith.addi %47, %46 : i32
      %54 = arith.select %52, %53, %47 : i32
      %c0_i32_44 = arith.constant 0 : i32
      %c0_i32_45 = arith.constant 0 : i32
      %55 = tpu.memref_slice %arg2[%c0_i32_44, %c0_i32_45] : memref<256x128xf32, #tpu.memory_space<any>> -> memref<1x128xf32, #tpu.memory_space<any>>
      %c0_i32_46 = arith.constant 0 : i32
      %56 = tpu.memref_slice %arg4[%arg6, %c0_i32_46] : memref<16x128xf32, #tpu.memory_space<vmem>> -> memref<1x128xf32, #tpu.memory_space<vmem>>
      %57 = tpu.memref_slice %arg5[%54] : memref<8x!tpu.dma_semaphore, #tpu.memory_space<semaphore_mem>> -> memref<1x!tpu.dma_semaphore, #tpu.memory_space<semaphore_mem>>
      %58 = tpu.memref_squeeze %57 : memref<1x!tpu.dma_semaphore, #tpu.memory_space<semaphore_mem>> -> memref<!tpu.dma_semaphore, #tpu.memory_space<semaphore_mem>>
      tpu.wait_dma2 semaphore(%58 : memref<!tpu.dma_semaphore, #tpu.memory_space<semaphore_mem>>) src(%55 : memref<1x128xf32, #tpu.memory_space<any>>) dst(%56 : memref<1x128xf32, #tpu.memory_space<vmem>>)
      %c8_i32_47 = arith.constant 8 : i32
      %59 = arith.addi %arg6, %c8_i32_47 : i32
      %c16_i32_48 = arith.constant 16 : i32
      %60 = arith.cmpi slt, %59, %c16_i32_48 : i32
      %61 = arith.extui %60 : i1 to i32
      %c0_i32_49 = arith.constant 0 : i32
      %62 = arith.cmpi ne, %61, %c0_i32_49 : i32
      scf.if %62 {
        %c8_i32_50 = arith.constant 8 : i32
        %63 = arith.addi %arg6, %c8_i32_50 : i32
        %c0_51 = arith.constant 0 : index
        %64 = arith.index_cast %63 : i32 to index
        %65 = memref.load %arg1[%c0_51, %64] : memref<1x16xi32, #tpu.memory_space<smem>>
        %c8_i32_52 = arith.constant 8 : i32
        %c0_i32_53 = arith.constant 0 : i32
        %66 = arith.cmpi eq, %c8_i32_52, %c0_i32_53 : i32
        %c1_i32_54 = arith.constant 1 : i32
        %67 = arith.select %66, %c1_i32_54, %c8_i32_52 : i32
        %68 = arith.remsi %63, %67 : i32
        %c0_i32_55 = arith.constant 0 : i32
        %69 = arith.cmpi ne, %68, %c0_i32_55 : i32
        %c0_i32_56 = arith.constant 0 : i32
        %70 = arith.cmpi slt, %68, %c0_i32_56 : i32
        %c0_i32_57 = arith.constant 0 : i32
        %71 = arith.cmpi slt, %67, %c0_i32_57 : i32
        %72 = arith.xori %70, %71 : i1
        %73 = arith.andi %72, %69 : i1
        %74 = arith.addi %68, %67 : i32
        %75 = arith.select %73, %74, %68 : i32
        %c0_i32_58 = arith.constant 0 : i32
        %76 = tpu.memref_slice %arg2[%65, %c0_i32_58] : memref<256x128xf32, #tpu.memory_space<any>> -> memref<1x128xf32, #tpu.memory_space<any>>
        %c0_i32_59 = arith.constant 0 : i32
        %77 = tpu.memref_slice %arg4[%63, %c0_i32_59] : memref<16x128xf32, #tpu.memory_space<vmem>> -> memref<1x128xf32, #tpu.memory_space<vmem>>
        %78 = tpu.memref_slice %arg5[%75] : memref<8x!tpu.dma_semaphore, #tpu.memory_space<semaphore_mem>> -> memref<1x!tpu.dma_semaphore, #tpu.memory_space<semaphore_mem>>
        %79 = tpu.memref_squeeze %78 : memref<1x!tpu.dma_semaphore, #tpu.memory_space<semaphore_mem>> -> memref<!tpu.dma_semaphore, #tpu.memory_space<semaphore_mem>>
        tpu.enqueue_dma source(%76 : memref<1x128xf32, #tpu.memory_space<any>>) target(%77 : memref<1x128xf32, #tpu.memory_space<vmem>>) target_semaphore(%79 : memref<!tpu.dma_semaphore, #tpu.memory_space<semaphore_mem>>)
      } else {
      }
    }
    %c16_i32_34 = arith.constant 16 : i32
    %c0_35 = arith.constant 0 : index
    %c0_36 = arith.constant 0 : index
    %41 = vector.load %arg4[%c0_35, %c0_36] : memref<16x128xf32, #tpu.memory_space<vmem>>, vector<16x128xf32>
    %cst = arith.constant 11.3137083 : f32
    %42 = vector.broadcast %cst : f32 to vector<16x128xf32>
    %43 = arith.mulf %41, %42 : vector<16x128xf32>
    %c0_37 = arith.constant 0 : index
    %c0_38 = arith.constant 0 : index
    %44 = vector.load %arg3[%c0_37, %c0_38] : memref<16x128xf32, #tpu.memory_space<vmem>>, vector<16x128xf32>
    tpu.vector_store %arg3[%c0_37, %c0_38], %43 {strides = array<i32>} : memref<16x128xf32, #tpu.memory_space<vmem>>, vector<16x128xf32>,
    return
  }
  func.func @transform_0(%arg0: i32) -> (i32, i32) {
    %c0_i32 = arith.constant 0 : i32
    %c0_i32_0 = arith.constant 0 : i32
    return %arg0, %c0_i32 : i32, i32
  }
  func.func @transform_2(%arg0: i32) -> (i32, i32) {
    %c0_i32 = arith.constant 0 : i32
    %c0_i32_0 = arith.constant 0 : i32
    return %arg0, %c0_i32 : i32, i32
  }
}

</mosaic_0001>

<bundles_post_ra>
// kernel: tpu_custom_call.1
= control target key start
LH: loop header
LB: loop body
LE: loop exit
PB: predicated region body
PF: predicated region fallthrough
CT: control target
= control target key end

     0   :  { %7 = vsyncpa [#allocation6], 0  ;;  %s791_s0 = inlined_call_operand.hbm [shape: s32[1,16], index: 0, kind: input, shape index: {}]   ;;  %s792_s1 = inlined_call_operand.hbm [shape: f32[256,128], index: 1, kind: input, shape index: {}]   ;;  %s793_s2 = inlined_call_operand.hbm [shape: f32[16,128], index: 2, kind: output, shape index: {}]  }
   0x1   :  { %8 = vsyncpa [#allocation5], 0  ;;  %s14_s11 = sshll.u32 %s791_s0, 4  ;;  %s628_s12 = smov [#allocation4]   ;;  %s15_s11 = int_to_ptr.hbm [resolvable:$true] %s14_s11 }
   0x2   :  { %17 = dma.hbm_to_smem %s15_s11, 16, %s628_s12, [#allocation6]  }
   0x3   :  { %618 = dma.done.wait [#allocation6], 16  }
   0x4   :  { %619 = vsyncadd [#allocation6], 4294967280 }
   0x5   :  { %22 = sfence }
   0x6   :  { %s23_s13 = sld [smem:[#allocation4]]  ;;  %s629_s14 = smov [#allocation2]  }
   0x7   :  { %s34_s15 = sshll.u32 %s629_s14, 4  ;;  %s311_s16 = sld [smem:[#allocation4 + $0x1]]  ;;  %s35_s15 = int_to_ptr.vmem [resolvable:$true] %s34_s15 }
   0x8   :  { %s630_s17 = smov [#allocation2 + $0x1]   ;;  %s661_s19 = sld [smem:[#allocation4 + $0x2]] }
   0x9   :  { %s659_s18 = sshll.u32 %s630_s17, 4  ;;  %s631_s20 = smov [#allocation2 + $0x2]   ;;  %s52_s18 = int_to_ptr.vmem [resolvable:$true] %s659_s18 }
   0xa   :  { %s664_s0 = sshll.u32 %s631_s20, 4  ;;  %s666_s21 = sld [smem:[#allocation4 + $0x3]]  ;;  %s69_s0 = int_to_ptr.vmem [resolvable:$true] %s664_s0 }
   0xb   :  { %s678_s6 = scalar_lea.hbm %s792_s1, 256 }
   0xc   :  { %s24_s24 = scalar_lea.hbm %s792_s1, %s23_s13 }
   0xd   :  { %s32_s25 = sshll.u32 %s24_s24, 4  ;;  %s39_s28 = scalar_lea.hbm %s792_s1, %s311_s16  ;;  %s33_s25 = int_to_ptr.hbm [resolvable:$true] %s32_s25 }
   0xe   :  { %s49_s29 = sshll.u32 %s39_s28, 4  ;;  %s370_s30 = sshra.s32 %s33_s25, 4  ;;  %s371_s30 = int_to_ptr.hbm [resolvable:$true] %s370_s30  ;;  %s50_s29 = int_to_ptr.hbm [resolvable:$true] %s49_s29 }
   0xf   :  { %s372_s3 = scalar_lea.hbm %s371_s30, 1  ;;  %p375_p1 = scmp.lt.s32.totalorder %s371_s30, %s792_s1 }
  0x10   :  { %p373_p0 = scmp.ne.s32.totalorder %s371_s30, %s372_s3  ;;  %p376_p2 = scmp.lt.s32.totalorder %s678_s6, %s372_s3 }
  0x12   :  { %p377_p3 = por %p376_p2, %p375_p1 }
  0x14   :  { %p378_p4 = pnand %p377_p3, %p373_p0 }
  0x16   :  { %381 = shalt.err (!%p378_p4)  }
  0x17   :  { %37 = dma.hbm_to_vmem [thread:$0]  %s33_s25, 16, %s35_s15, [#allocation3] }
  0x18   :  { %s56_s11 = scalar_lea.hbm %s792_s1, %s661_s19  ;;  %s394_s12 = sshra.s32 %s50_s29, 4  ;;  %s395_s12 = int_to_ptr.hbm [resolvable:$true] %s394_s12 }
  0x19   :  { %s396_s13 = scalar_lea.hbm %s395_s12, 1  ;;  %p399_p6 = scmp.lt.s32.totalorder %s395_s12, %s792_s1 }
  0x1a   :  { %p397_p5 = scmp.ne.s32.totalorder %s395_s12, %s396_s13  ;;  %p400_p7 = scmp.lt.s32.totalorder %s678_s6, %s396_s13 }
  0x1c   :  { %p401_p8 = por %p400_p7, %p399_p6 }
  0x1e   :  { %p402_p9 = pnand %p401_p8, %p397_p5 }
  0x20   :  { %405 = shalt.err (!%p402_p9)  }
  0x21   :  { %54 = dma.hbm_to_vmem [thread:$0]  %s50_s29, 16, %s52_s18, [#allocation3 + $0x1] }
  0x22   :  { %s66_s15 = sshll.u32 %s56_s11, 4  ;;  %s73_s20 = scalar_lea.hbm %s792_s1, %s666_s21  ;;  %s67_s15 = int_to_ptr.hbm [resolvable:$true] %s66_s15 }
  0x23   :  { %s83_s22 = sshll.u32 %s73_s20, 4  ;;  %s418_s23 = sshra.s32 %s67_s15, 4  ;;  %s419_s23 = int_to_ptr.hbm [resolvable:$true] %s418_s23  ;;  %s84_s22 = int_to_ptr.hbm [resolvable:$true] %s83_s22 }
  0x24   :  { %s420_s24 = scalar_lea.hbm %s419_s23, 1  ;;  %p423_p11 = scmp.lt.s32.totalorder %s419_s23, %s792_s1 }
  0x25   :  { %p421_p10 = scmp.ne.s32.totalorder %s419_s23, %s420_s24  ;;  %p424_p12 = scmp.lt.s32.totalorder %s678_s6, %s420_s24 }
  0x27   :  { %p425_p13 = por %p424_p12, %p423_p11 }
  0x29   :  { %p426_p0 = pnand %p425_p13, %p421_p10 }
  0x2b   :  { %429 = shalt.err (!%p426_p0)  }
  0x2c   :  { %71 = dma.hbm_to_vmem [thread:$0]  %s67_s15, 16, %s69_s0, [#allocation3 + $0x2] }
  0x2d   :  { %s632_s18 = smov [#allocation2 + $0x3]   ;;  %s314_s27 = sld [smem:[#allocation4 + $0x4]] }
  0x2e   :  { %s85_s21 = sshll.u32 %s632_s18, 4  ;;  %s442_s28 = sshra.s32 %s84_s22, 4  ;;  %s86_s21 = int_to_ptr.vmem [resolvable:$true] %s85_s21  ;;  %s443_s28 = int_to_ptr.hbm [resolvable:$true] %s442_s28 }
  0x2f   :  { %s444_s29 = scalar_lea.hbm %s443_s28, 1  ;;  %p447_p2 = scmp.lt.s32.totalorder %s443_s28, %s792_s1 }
  0x30   :  { %p445_p1 = scmp.ne.s32.totalorder %s443_s28, %s444_s29  ;;  %p448_p3 = scmp.lt.s32.totalorder %s678_s6, %s444_s29 }
  0x32   :  { %p449_p4 = por %p448_p3, %p447_p2 }
  0x34   :  { %p450_p5 = pnand %p449_p4, %p445_p1 }
  0x36   :  { %453 = shalt.err (!%p450_p5)  }
  0x37   :  { %88 = dma.hbm_to_vmem [thread:$0]  %s84_s22, 16, %s86_s21, [#allocation3 + $0x3] }
  0x38   :  { %s633_s4 = smov [#allocation2 + $0x4]   ;;  %s315_s5 = sld [smem:[#allocation4 + $0x5]] }
  0x39   :  { %s102_s0 = sshll.u32 %s633_s4, 4  ;;  %s634_s7 = smov [#allocation2 + $0x5]   ;;  %s103_s0 = int_to_ptr.vmem [resolvable:$true] %s102_s0 }
  0x3a   :  { %s708_s8 = sshll.u32 %s634_s7, 4  ;;  %s316_s9 = sld [smem:[#allocation4 + $0x6]]  ;;  %s120_s8 = int_to_ptr.vmem [resolvable:$true] %s708_s8 }
  0x3b   :  { %s90_s12 = scalar_lea.hbm %s792_s1, %s314_s27  ;;  %s635_s14 = smov [#allocation2 + $0x6]  }
  0x3c   :  { %s100_s13 = sshll.u32 %s90_s12, 4  ;;  %s714_s16 = sshll.u32 %s635_s14, 4  ;;  %s101_s13 = int_to_ptr.hbm [resolvable:$true] %s100_s13  ;;  %s137_s16 = int_to_ptr.vmem [resolvable:$true] %s714_s16 }
  0x3d   :  { %s466_s15 = sshra.s32 %s101_s13, 4  ;;  %s467_s15 = int_to_ptr.hbm [resolvable:$true] %s466_s15 }
  0x3e   :  { %s468_s17 = scalar_lea.hbm %s467_s15, 1  ;;  %p471_p7 = scmp.lt.s32.totalorder %s467_s15, %s792_s1 }
  0x3f   :  { %p469_p6 = scmp.ne.s32.totalorder %s467_s15, %s468_s17  ;;  %p472_p8 = scmp.lt.s32.totalorder %s678_s6, %s468_s17 }
  0x41   :  { %p473_p9 = por %p472_p8, %p471_p7 }
  0x43   :  { %p474_p10 = pnand %p473_p9, %p469_p6 }
  0x45   :  { %477 = shalt.err (!%p474_p10)  }
  0x46   :  { %105 = dma.hbm_to_vmem [thread:$0]  %s101_s13, 16, %s103_s0, [#allocation3 + $0x4] }
  0x47   :  { %s107_s24 = scalar_lea.hbm %s792_s1, %s315_s5  ;;  %s124_s21 = scalar_lea.hbm %s792_s1, %s316_s9 }
  0x48   :  { %s117_s25 = sshll.u32 %s107_s24, 4  ;;  %s134_s27 = sshll.u32 %s124_s21, 4  ;;  %s118_s25 = int_to_ptr.hbm [resolvable:$true] %s117_s25  ;;  %s135_s27 = int_to_ptr.hbm [resolvable:$true] %s134_s27 }
  0x49   :  { %s490_s28 = sshra.s32 %s118_s25, 4  ;;  %s491_s28 = int_to_ptr.hbm [resolvable:$true] %s490_s28 }
  0x4a   :  { %s492_s29 = scalar_lea.hbm %s491_s28, 1  ;;  %p495_p12 = scmp.lt.s32.totalorder %s491_s28, %s792_s1 }
  0x4b   :  { %p493_p11 = scmp.ne.s32.totalorder %s491_s28, %s492_s29  ;;  %p496_p13 = scmp.lt.s32.totalorder %s678_s6, %s492_s29 }
  0x4d   :  { %p497_p0 = por %p496_p13, %p495_p12 }
  0x4f   :  { %p498_p1 = pnand %p497_p0, %p493_p11 }
  0x51   :  { %501 = shalt.err (!%p498_p1)  }
  0x52   :  { %122 = dma.hbm_to_vmem [thread:$0]  %s118_s25, 16, %s120_s8, [#allocation3 + $0x5] }
  0x53   :  { %s317_s4 = sld [smem:[#allocation4 + $0x7]]  ;;  %s514_s0 = sshra.s32 %s135_s27, 4  ;;  %s515_s0 = int_to_ptr.hbm [resolvable:$true] %s514_s0 }
  0x54   :  { %s516_s5 = scalar_lea.hbm %s515_s0, 1  ;;  %p519_p3 = scmp.lt.s32.totalorder %s515_s0, %s792_s1 }
  0x55   :  { %p517_p2 = scmp.ne.s32.totalorder %s515_s0, %s516_s5  ;;  %p520_p4 = scmp.lt.s32.totalorder %s678_s6, %s516_s5 }
  0x57   :  { %p521_p5 = por %p520_p4, %p519_p3 }
  0x59   :  { %p522_p6 = pnand %p521_p5, %p517_p2 }
  0x5b   :  { %525 = shalt.err (!%p522_p6)  }
  0x5c   :  { %139 = dma.hbm_to_vmem [thread:$0]  %s135_s27, 16, %s137_s16, [#allocation3 + $0x6] }
  0x5d   :  { %s636_s10 = smov [#allocation2 + $0x7]   ;;  %s141_s13 = scalar_lea.hbm %s792_s1, %s317_s4 }
  0x5e   :  { %s153_s11 = sshll.u32 %s636_s10, 4  ;;  %s151_s14 = sshll.u32 %s141_s13, 4  ;;  %s154_s11 = int_to_ptr.vmem [resolvable:$true] %s153_s11  ;;  %s152_s14 = int_to_ptr.hbm [resolvable:$true] %s151_s14 }
  0x5f   :  { %s538_s15 = sshra.s32 %s152_s14, 4  ;;  %s539_s15 = int_to_ptr.hbm [resolvable:$true] %s538_s15 }
  0x60   :  { %s540_s17 = scalar_lea.hbm %s539_s15, 1  ;;  %p543_p8 = scmp.lt.s32.totalorder %s539_s15, %s792_s1 }
  0x61   :  { %p541_p7 = scmp.ne.s32.totalorder %s539_s15, %s540_s17  ;;  %p544_p9 = scmp.lt.s32.totalorder %s678_s6, %s540_s17 }
  0x63   :  { %p545_p10 = por %p544_p9, %p543_p8 }
  0x65   :  { %p546_p11 = pnand %p545_p10, %p541_p7 }
  0x67   :  { %549 = shalt.err (!%p546_p11)  }
  0x68   :  { %156 = dma.hbm_to_vmem [thread:$0]  %s152_s14, 16, %s154_s11, [#allocation3 + $0x7] }
  0x69   :  { %s744_s16 = smov 0  }
  0x6a LB: > { %p163_p12 = scmp.lt.s32.totalorder %s626_s16, 0  ;;  %s164_s22 = ssub.s32 0, %s626_s16  ;;  %s626_s16 = sphi %s744_s16, %s162_s16  }
  0x6b   : > { %s318_s23 = smin.u32 %s626_s16, %s164_s22 }
  0x6c   : > { %s166_s24 = sand.u32 7, %s318_s23  }
  0x6d   : > { %s167_s25 = ssub.s32 0, %s166_s24 }
  0x6e   : > { %s795_s25 = smov (!%p163_p12, %s167_s25), %s166_s24 }
  0x6f   : > { %p320_p13 = scmp.lt.s32.totalorder %s795_s25, 0  ;;  %s173_s26 = sadd.s32 8, %s795_s25 }
  0x71   : > { %s797_s26 = smov (!%p320_p13, %s173_s26), %s795_s25 }
  0x72   : > { %s175_s18 = scalar_lea.sflag [#allocation3], %s797_s26 }
  0x73   : > { %620 = dma.done.wait %s175_s18, 16 }
  0x74   : > { %621 = vsyncadd %s175_s18, 4294967280  ;;  %s753_s21 = sadd.s32 8, %s626_s16  ;;  %s303_s5 = scalar_lea.vmem [#allocation2], %s626_s16 }
  0x75   : > { %p337_p0 = scmp.lt.s32.totalorder %s753_s21, 16  ;;  %p185_p1 = scmp.lt.s32.totalorder %s753_s21, 0 }
  0x76   : > { %s186_s27 = ssub.s32 0, %s753_s21  ;;  %s304_s7 = scalar_lea.vmem %s303_s5, 8 [#allocation2] }
  0x77   : > { %s334_s28 = scalar_select %p337_p0, [#allocation4], [#allocation28] }
  0x78   : > { %s335_s29 = scalar_select %p337_p0, %s753_s21, 0 }
  0x79   : > { %s322_s30 = smin.u32 %s186_s27, %s753_s21  ;;  %s209_s9 = sshll.u32 %s304_s7, 4  ;;  %s210_s9 = int_to_ptr.vmem [resolvable:$true] %s209_s9 }
  0x7a   : > { %s184_s3 = sld [smem:[%s334_s28 + %s335_s29]]  ;;  %s188_s4 = sand.u32 7, %s322_s30  }
  0x7b   : > { %s189_s0 = ssub.s32 0, %s188_s4 }
  0x7c   : > { %s799_s0 = smov (!%p185_p1, %s189_s0), %s188_s4 }
  0x7d   : > { %p324_p2 = scmp.lt.s32.totalorder %s799_s0, 0  ;;  %s195_s8 = sadd.s32 8, %s799_s0 }
  0x7f   : > { %s801_s8 = smov (!%p324_p2, %s195_s8), %s799_s0 }
  0x80   : > { %s197_s12 = scalar_lea.hbm %s792_s1, %s184_s3  ;;  %s199_s14 = scalar_lea.sflag [#allocation3], %s801_s8 }
  0x81   : > { %s768_s13 = sshll.u32 %s197_s12, 4  ;;  %s208_s13 = int_to_ptr.hbm [resolvable:$true] %s768_s13 }
  0x82   : > { %s562_s15 = sshra.s32 %s208_s13, 4  ;;  %s563_s15 = int_to_ptr.hbm [resolvable:$true] %s562_s15 }
  0x83   : > { %s564_s17 = scalar_lea.hbm %s563_s15, 1  ;;  %p569_p6 = scmp.lt.s32.totalorder %s563_s15, %s792_s1 }
  0x84   : > { %p565_p3 = scmp.ne.s32.totalorder %s563_s15, %s564_s17  ;;  %p570_p7 = scmp.lt.s32.totalorder %s678_s6, %s564_s17 }
  0x86   : > { %p566_p4 = pnand %p565_p3, %p337_p0  ;;  %p571_p8 = por %p570_p7, %p569_p6 }
  0x88   : > { %p567_p5 = pneg %p566_p4 }
  0x8a   : > { %p572_p9 = pnand %p571_p8, %p567_p5 }
  0x8c   : > { %575 = shalt.err (!%p572_p9)  }
  0x8d   : > { %s576_s22 = sshra.s32 %s210_s9, 4  ;;  %s637_s24 = smov [#allocation2]   ;;  %s577_s22 = int_to_ptr.vmem [resolvable:$true] %s576_s22 }
  0x8e   : > { %s578_s23 = scalar_lea.vmem %s577_s22, 1  ;;  %s582_s25 = scalar_lea.vmem %s637_s24, 16 }
  0x8f   : > { %p579_p10 = scmp.ne.s32.totalorder %s577_s22, %s578_s23  ;;  %p583_p13 = scmp.lt.s32.totalorder %s577_s22, [#allocation2] }
  0x90   : > { %p584_p1 = scmp.lt.s32.totalorder %s582_s25, %s578_s23 }
  0x91   : > { %p580_p11 = pnand %p579_p10, %p337_p0 }
  0x92   : > { %p585_p2 = por %p584_p1, %p583_p13 }
  0x93   : > { %p581_p12 = pneg %p580_p11 }
  0x95   : > { %p586_p3 = pnand %p585_p2, %p581_p12 }
  0x97   : > { %589 = shalt.err (!%p586_p3)  }
  0x98   : > { %336 = dma.hbm_to_vmem [thread:$0]  (%p337_p0), %s208_s13, 16, %s210_s9, %s199_s14 }
  0x99   : > { %s162_s16 = sadd.s32 1, %s626_s16  }
  0x9a   : > { %p159_p4 = scmp.ge.s32.totalorder %s162_s16, 16  }
  0x9b   :  { %v213_v0 = vld [vmem:[#allocation2] sm:$0xff] (%p159_p4)  ;;  %v214_v1 = vld [vmem:[#allocation2 + $0x8] sm:$0xff] (%p159_p4)  ;;  %s225_s27 = sshll.u32 (%p159_p4), %s793_s2, 4  ;;  %s638_s28 = smov (%p159_p4), [#allocation7]   ;;  %s226_s27 = int_to_ptr.hbm [resolvable:$true] %s225_s27 }
  0x9c   :  { %161 = sbr.rel (!%p159_p4) target bundleno = 106 (0x6a), region = 108  ;;  %v215_v2 = vmul.f32 (%p159_p4), 11.313708, %v213_v0  ;;  %v216_v3 = vmul.f32 (%p159_p4), 11.313708, %v214_v1  ;;  %s223_s29 = sshll.u32 (%p159_p4), %s638_s28, 4  ;;  %s224_s29 = int_to_ptr.vmem [resolvable:$true] %s223_s29 }
  0x9d   :  { %s639_s21 = smov (%p159_p4), 128   ;;  %s640_s30 = smov (%p159_p4), 8  }
  0x9e   :  { %217 = vst [vmem:[#allocation7] sm:$0xff] (%p159_p4), %v215_v2 }
  0x9f   :  { %218 = vst [vmem:[#allocation7 + $0x8] sm:$0xff] (%p159_p4), %v216_v3 }
  0xa0   :  { %231 = dma.vmem_to_hbm [thread:$0]  (%p159_p4), %s224_s29, 256, %s226_s27, [#allocation5], %s639_s21, %s639_s21, %s640_s30  }
  0xa1   :  { %622 = dma.done.wait [#allocation5], 256  }
  0xa2   :  { %623 = vsyncadd [#allocation5], 4294967040 }
  0xa3   :  { %236 = vsyncpa [#allocation5], 1 }
  0xa4   :  { %237 = vsyncpa [#allocation6], 1 }
  0xa5   :  { %238 = vsyncmov [#allocation3] }
  0xa8   :  { %s239_s1 = vpop.sfrf %238 }
  0xa9   :  { %p325_p0 = scmp.ne.s32.totalorder %s239_s1, 0 }
  0xab   :  { %243 = shalt.err (%p325_p0)  }
  0xac   :  { %245 = vsyncmov [#allocation3 + $0x1] }
  0xaf   :  { %s246_s2 = vpop.sfrf %245 }
  0xb0   :  { %p326_p5 = scmp.ne.s32.totalorder %s246_s2, 0 }
  0xb2   :  { %250 = shalt.err (%p326_p5)  }
  0xb3   :  { %252 = vsyncmov [#allocation3 + $0x2] }
  0xb6   :  { %s253_s6 = vpop.sfrf %252 }
  0xb7   :  { %p327_p6 = scmp.ne.s32.totalorder %s253_s6, 0 }
  0xb9   :  { %257 = shalt.err (%p327_p6)  }
  0xba   :  { %259 = vsyncmov [#allocation3 + $0x3] }
  0xbd   :  { %s260_s16 = vpop.sfrf %259 }
  0xbe   :  { %p328_p7 = scmp.ne.s32.totalorder %s260_s16, 0 }
  0xc0   :  { %264 = shalt.err (%p328_p7)  }
  0xc1   :  { %266 = vsyncmov [#allocation3 + $0x4] }
  0xc4   :  { %s267_s3 = vpop.sfrf %266 }
  0xc5   :  { %p329_p8 = scmp.ne.s32.totalorder %s267_s3, 0 }
  0xc7   :  { %271 = shalt.err (%p329_p8)  }
  0xc8   :  { %273 = vsyncmov [#allocation3 + $0x5] }
  0xcb   :  { %s274_s4 = vpop.sfrf %273 }
  0xcc   :  { %p330_p9 = scmp.ne.s32.totalorder %s274_s4, 0 }
  0xce   :  { %278 = shalt.err (%p330_p9)  }
  0xcf   :  { %280 = vsyncmov [#allocation3 + $0x6] }
  0xd2   :  { %s281_s0 = vpop.sfrf %280 }
  0xd3   :  { %p331_p10 = scmp.ne.s32.totalorder %s281_s0, 0 }
  0xd5   :  { %285 = shalt.err (%p331_p10)  }
  0xd6   :  { %287 = vsyncmov [#allocation3 + $0x7] }
  0xd9   :  { %s288_s5 = vpop.sfrf %287 }
  0xda   :  { %p332_p11 = scmp.ne.s32.totalorder %s288_s5, 0 }
  0xdc   :  { %292 = shalt.err (%p332_p11)  }

</bundles_post_ra>
